<compile_context>
chip_gen: v5e
topology: v5e:2x2
jax: 0.10.0
libtpu: 0.0.40
codegen_flags: <defaults>
</compile_context>

<pallas_src>
import jax
import jax.numpy as jnp
from jax.experimental import pallas as pl
from jax.experimental.pallas import tpu as pltpu

OUT_PAD = 128  # lane-dense packed-output width (one full lane group)


def make_actor_critic_kernel(hidden, num_outputs):
    """Kernel closure over the static sizes needed for slicing / packing."""

    def kernel(x_ref,
               w1_ref, b1_ref,            # fused layer-1 (critic||actor)
               cw2_ref, cb2_ref,          # critic layer-2
               aw2_ref, ab2_ref,          # actor  layer-2
               aw3_ref, ab3_ref,          # actor head (lane-padded to OUT_PAD)
               cw3_ref, cb3_ref,          # critic head as a [1, hidden] row + [1,1] bias
               out_ref):                  # packed [TILE_B, OUT_PAD] output slab
        x = x_ref[...]

        # ---- fused layer 1: one matmul for both towers ----
        h1 = jnp.dot(x, w1_ref[...], preferred_element_type=jnp.float32) + b1_ref[...]
        h1 = jnp.maximum(h1, 0.0)
        hc = h1[:, :hidden]        # critic branch
        ha = h1[:, hidden:]        # actor branch

        # ---- layer 2 (per tower) ----
        hc = jnp.maximum(
            jnp.dot(hc, cw2_ref[...], preferred_element_type=jnp.float32) + cb2_ref[...],
            0.0)
        ha = jnp.maximum(
            jnp.dot(ha, aw2_ref[...], preferred_element_type=jnp.float32) + ab2_ref[...],
            0.0)

        # ---- actor head: lane-padded weight -> mu already 128 lanes wide ----
        mu = jnp.tanh(
            jnp.dot(ha, aw3_ref[...], preferred_element_type=jnp.float32) + ab3_ref[...])

        # ---- critic head: 1-column matmul -> VPU multiply + lane reduce ----
        value = jnp.sum(hc * cw3_ref[...], axis=-1, keepdims=True) + cb3_ref[...]

        # ---- pack: lanes [0,num_outputs)=mu, lane num_outputs=value, rest=0 ----
        lane = jax.lax.broadcasted_iota(jnp.int32, mu.shape, 1)
        out_ref[...] = jnp.where(lane == num_outputs, value, mu).astype(out_ref.dtype)

    return kernel


def actor_critic_forward(x, params, tile_b_max=512):
    """x: [B, num_inputs] f32.  Returns (mu, std, value) matching PyTorch."""
    B, num_inputs = x.shape
    hidden = params["cw2"].shape[0]
    num_outputs = params["aw3"].shape[1]
    assert num_outputs + 1 <= OUT_PAD

    # ---- host-side weight packing ----
    w1_cat = jnp.concatenate([params["cw1"], params["aw1"]], axis=1)   # [in, 2h]
    b1_cat = jnp.concatenate([params["cb1"], params["ab1"]], axis=1)   # [1, 2h]
    aw3_pad = jnp.zeros((hidden, OUT_PAD), jnp.float32).at[:, :num_outputs].set(params["aw3"])
    ab3_pad = jnp.zeros((1, OUT_PAD), jnp.float32).at[:, :num_outputs].set(params["ab3"])
    cw3_row = params["cw3"].T                                          # [1, hidden]
    cb3 = params["cb3"]                                                # [1, 1]

    # ---- batch tiling ----
    def round_up(a, m):
        return (a + m - 1) // m * m

    tile_b = min(tile_b_max, round_up(B, 8))
    B_pad = round_up(B, tile_b)
    x_p = x if B_pad == B else jnp.pad(x, ((0, B_pad - B), (0, 0)))
    grid = (B_pad // tile_b,)

    batch_spec = pl.BlockSpec((tile_b, num_inputs), lambda i: (i, 0))
    out_spec = pl.BlockSpec((tile_b, OUT_PAD), lambda i: (i, 0))

    def resident(shape):
        # full-array block, same index every grid step -> stays in VMEM
        return pl.BlockSpec(shape, lambda i: (0, 0))

    flops = 2 * B_pad * (num_inputs * 2 * hidden + 2 * hidden * hidden
                         + hidden * OUT_PAD + hidden)
    bytes_accessed = 4 * (x_p.size + w1_cat.size + b1_cat.size
                          + params["cw2"].size + params["cb2"].size
                          + params["aw2"].size + params["ab2"].size
                          + aw3_pad.size + ab3_pad.size
                          + cw3_row.size + cb3.size + B_pad * OUT_PAD)
    cost = pl.CostEstimate(flops=flops,
                           transcendentals=B_pad * OUT_PAD,
                           bytes_accessed=bytes_accessed)

    out = pl.pallas_call(
        make_actor_critic_kernel(hidden, num_outputs),
        out_shape=jax.ShapeDtypeStruct((B_pad, OUT_PAD), jnp.float32),
        grid=grid,
        in_specs=[batch_spec,
                  resident(w1_cat.shape), resident(b1_cat.shape),
                  resident(params["cw2"].shape), resident(params["cb2"].shape),
                  resident(params["aw2"].shape), resident(params["ab2"].shape),
                  resident(aw3_pad.shape), resident(ab3_pad.shape),
                  resident(cw3_row.shape), resident(cb3.shape)],
        out_specs=out_spec,
        compiler_params=pltpu.CompilerParams(dimension_semantics=("parallel",)),
        cost_estimate=cost,
    )(x_p, w1_cat, b1_cat,
      params["cw2"], params["cb2"], params["aw2"], params["ab2"],
      aw3_pad, ab3_pad, cw3_row, cb3)

    mu = out[:B, :num_outputs]
    value = out[:B, num_outputs:num_outputs + 1]
    # std = exp(log_std).expand_as(mu) does not depend on x -> plain JAX.
    std = jnp.broadcast_to(jnp.exp(params["log_std"]), mu.shape)
    return mu, std, value


def init_params(key, num_inputs, num_outputs, hidden_size, std=0.0):
    """Deterministic init mimicking nn.Linear (uniform +/- 1/sqrt(fan_in)).
    Weights stored as [in, out] (transposed vs PyTorch)."""
    def linear(k, fan_in, fan_out):
        kw, kb = jax.random.split(k)
        bound = 1.0 / jnp.sqrt(fan_in)
        w = jax.random.uniform(kw, (fan_in, fan_out), jnp.float32, -bound, bound)
        b = jax.random.uniform(kb, (1, fan_out), jnp.float32, -bound, bound)
        return w, b

    keys = jax.random.split(key, 6)
    cw1, cb1 = linear(keys[0], num_inputs, hidden_size)
    cw2, cb2 = linear(keys[1], hidden_size, hidden_size)
    cw3, cb3 = linear(keys[2], hidden_size, 1)
    aw1, ab1 = linear(keys[3], num_inputs, hidden_size)
    aw2, ab2 = linear(keys[4], hidden_size, hidden_size)
    aw3, ab3 = linear(keys[5], hidden_size, num_outputs)
    log_std = jnp.ones((1, num_outputs), jnp.float32) * std
    return dict(cw1=cw1, cb1=cb1, cw2=cw2, cb2=cb2, cw3=cw3, cb3=cb3,
                aw1=aw1, ab1=ab1, aw2=aw2, ab2=ab2, aw3=aw3, ab3=ab3,
                log_std=log_std)


def reference_forward(x, p):
    """Pure-JAX reference matching the PyTorch module semantics."""
    relu = lambda v: jnp.maximum(v, 0.0)
    h = relu(x @ p["cw1"] + p["cb1"])
    h = relu(h @ p["cw2"] + p["cb2"])
    value = h @ p["cw3"] + p["cb3"]
    a = relu(x @ p["aw1"] + p["ab1"])
    a = relu(a @ p["aw2"] + p["ab2"])
    mu = jnp.tanh(a @ p["aw3"] + p["ab3"])
    std = jnp.broadcast_to(jnp.exp(p["log_std"]), mu.shape)
    return mu, std, value


if __name__ == "__main__":
    # Small shapes consistent with the module's num_layers=2 path.
    B, num_inputs, num_outputs, hidden_size = 8, 32, 8, 32

    key = jax.random.PRNGKey(0)
    kx, kp = jax.random.split(key)
    x = jax.random.normal(kx, (B, num_inputs), jnp.float32)
    params = init_params(kp, num_inputs, num_outputs, hidden_size, std=0.0)

    mu, std, value = jax.block_until_ready(actor_critic_forward(x, params))

    # Correctness check against pure-JAX reference.
    mu_r, std_r, value_r = reference_forward(x, params)
    assert jnp.allclose(mu, mu_r, atol=1e-5), "mu mismatch"
    assert jnp.allclose(std, std_r, atol=1e-5), "std mismatch"
    assert jnp.allclose(value, value_r, atol=1e-5), "value mismatch"

    # TODO(synk): torch.distributions.Normal object construction has no kernel
    # equivalent; the kernel returns its parameters (mu, std) instead.
    print("KERNEL_OK")
</pallas_src>

<mosaic_0001>
module attributes {stable_mosaic.version = 11 : i64} {
  func.func @kernel(%arg0: i32, %arg1: memref<8x32xf32, #tpu.memory_space<vmem>>, %arg2: memref<32x64xf32, #tpu.memory_space<vmem>>, %arg3: memref<1x64xf32, #tpu.memory_space<vmem>>, %arg4: memref<32x32xf32, #tpu.memory_space<vmem>>, %arg5: memref<1x32xf32, #tpu.memory_space<vmem>>, %arg6: memref<32x32xf32, #tpu.memory_space<vmem>>, %arg7: memref<1x32xf32, #tpu.memory_space<vmem>>, %arg8: memref<32x128xf32, #tpu.memory_space<vmem>>, %arg9: memref<1x128xf32, #tpu.memory_space<vmem>>, %arg10: memref<1x32xf32, #tpu.memory_space<vmem>>, %arg11: memref<1x1xf32, #tpu.memory_space<vmem>>, %arg12: memref<8x128xf32, #tpu.memory_space<vmem>>) attributes {dimension_semantics = [#tpu.dimension_semantics<parallel>], iteration_bounds = array<i64: 1>, scalar_prefetch = 0 : i64, scratch_operands = 0 : i64, tpu.core_type = #tpu.core_type<tc>, window_params = [{transform_indices = @transform_0, window_bounds = array<i64: 8, 32>}, {pipeline_mode = #tpu.pipeline_mode<synchronous>, transform_indices = @transform_1, window_bounds = array<i64: 32, 64>}, {pipeline_mode = #tpu.pipeline_mode<synchronous>, transform_indices = @transform_2, window_bounds = array<i64: 1, 64>}, {pipeline_mode = #tpu.pipeline_mode<synchronous>, transform_indices = @transform_3, window_bounds = array<i64: 32, 32>}, {pipeline_mode = #tpu.pipeline_mode<synchronous>, transform_indices = @transform_4, window_bounds = array<i64: 1, 32>}, {pipeline_mode = #tpu.pipeline_mode<synchronous>, transform_indices = @transform_5, window_bounds = array<i64: 32, 32>}, {pipeline_mode = #tpu.pipeline_mode<synchronous>, transform_indices = @transform_6, window_bounds = array<i64: 1, 32>}, {pipeline_mode = #tpu.pipeline_mode<synchronous>, transform_indices = @transform_7, window_bounds = array<i64: 32, 128>}, {pipeline_mode = #tpu.pipeline_mode<synchronous>, transform_indices = @transform_8, window_bounds = array<i64: 1, 128>}, {pipeline_mode = #tpu.pipeline_mode<synchronous>, transform_indices = @transform_9, window_bounds = array<i64: 1, 32>}, {pipeline_mode = #tpu.pipeline_mode<synchronous>, transform_indices = @transform_10, window_bounds = array<i64: 1, 1>}, {transform_indices = @transform_11, window_bounds = array<i64: 8, 128>}]} {
    %c0 = arith.constant 0 : index
    %c0_0 = arith.constant 0 : index
    %0 = vector.load %arg1[%c0, %c0_0] : memref<8x32xf32, #tpu.memory_space<vmem>>, vector<8x32xf32>
    %c0_1 = arith.constant 0 : index
    %c0_2 = arith.constant 0 : index
    %1 = vector.load %arg2[%c0_1, %c0_2] : memref<32x64xf32, #tpu.memory_space<vmem>>, vector<32x64xf32>
    %cst = arith.constant dense<0.000000e+00> : vector<8x64xf32>
    %2 = tpu.matmul %0, %1, %cst {dimension_numbers = #tpu.dot_dimension_numbers<[1], [0], [0], [1], [0, 0, 1, 1], [], []>} : vector<8x32xf32>, vector<32x64xf32>, vector<8x64xf32> -> vector<8x64xf32>
    %c0_3 = arith.constant 0 : index
    %c0_4 = arith.constant 0 : index
    %3 = vector.load %arg3[%c0_3, %c0_4] : memref<1x64xf32, #tpu.memory_space<vmem>>, vector<1x64xf32>
    %4 = vector.broadcast %3 : vector<1x64xf32> to vector<8x64xf32>
    %5 = arith.addf %2, %4 : vector<8x64xf32>
    %cst_5 = arith.constant 0.000000e+00 : f32
    %6 = vector.broadcast %cst_5 : f32 to vector<8x64xf32>
    %7 = arith.maximumf %5, %6 : vector<8x64xf32>
    %8 = vector.extract_strided_slice %7 {offsets = [0, 0], sizes = [8, 32], strides = [1, 1]} : vector<8x64xf32> to vector<8x32xf32>
    %9 = vector.extract_strided_slice %7 {offsets = [0, 32], sizes = [8, 32], strides = [1, 1]} : vector<8x64xf32> to vector<8x32xf32>
    %c0_6 = arith.constant 0 : index
    %c0_7 = arith.constant 0 : index
    %10 = vector.load %arg4[%c0_6, %c0_7] : memref<32x32xf32, #tpu.memory_space<vmem>>, vector<32x32xf32>
    %cst_8 = arith.constant dense<0.000000e+00> : vector<8x32xf32>
    %11 = tpu.matmul %8, %10, %cst_8 {dimension_numbers = #tpu.dot_dimension_numbers<[1], [0], [0], [1], [0, 0, 1, 1], [], []>} : vector<8x32xf32>, vector<32x32xf32>, vector<8x32xf32> -> vector<8x32xf32>
    %c0_9 = arith.constant 0 : index
    %c0_10 = arith.constant 0 : index
    %12 = vector.load %arg5[%c0_9, %c0_10] : memref<1x32xf32, #tpu.memory_space<vmem>>, vector<1x32xf32>
    %13 = vector.broadcast %12 : vector<1x32xf32> to vector<8x32xf32>
    %14 = arith.addf %11, %13 : vector<8x32xf32>
    %cst_11 = arith.constant 0.000000e+00 : f32
    %15 = vector.broadcast %cst_11 : f32 to vector<8x32xf32>
    %16 = arith.maximumf %14, %15 : vector<8x32xf32>
    %c0_12 = arith.constant 0 : index
    %c0_13 = arith.constant 0 : index
    %17 = vector.load %arg6[%c0_12, %c0_13] : memref<32x32xf32, #tpu.memory_space<vmem>>, vector<32x32xf32>
    %cst_14 = arith.constant dense<0.000000e+00> : vector<8x32xf32>
    %18 = tpu.matmul %9, %17, %cst_14 {dimension_numbers = #tpu.dot_dimension_numbers<[1], [0], [0], [1], [0, 0, 1, 1], [], []>} : vector<8x32xf32>, vector<32x32xf32>, vector<8x32xf32> -> vector<8x32xf32>
    %c0_15 = arith.constant 0 : index
    %c0_16 = arith.constant 0 : index
    %19 = vector.load %arg7[%c0_15, %c0_16] : memref<1x32xf32, #tpu.memory_space<vmem>>, vector<1x32xf32>
    %20 = vector.broadcast %19 : vector<1x32xf32> to vector<8x32xf32>
    %21 = arith.addf %18, %20 : vector<8x32xf32>
    %cst_17 = arith.constant 0.000000e+00 : f32
    %22 = vector.broadcast %cst_17 : f32 to vector<8x32xf32>
    %23 = arith.maximumf %21, %22 : vector<8x32xf32>
    %c0_18 = arith.constant 0 : index
    %c0_19 = arith.constant 0 : index
    %24 = vector.load %arg8[%c0_18, %c0_19] : memref<32x128xf32, #tpu.memory_space<vmem>>, vector<32x128xf32>
    %cst_20 = arith.constant dense<0.000000e+00> : vector<8x128xf32>
    %25 = tpu.matmul %23, %24, %cst_20 {dimension_numbers = #tpu.dot_dimension_numbers<[1], [0], [0], [1], [0, 0, 1, 1], [], []>} : vector<8x32xf32>, vector<32x128xf32>, vector<8x128xf32> -> vector<8x128xf32>
    %c0_21 = arith.constant 0 : index
    %c0_22 = arith.constant 0 : index
    %26 = vector.load %arg9[%c0_21, %c0_22] : memref<1x128xf32, #tpu.memory_space<vmem>>, vector<1x128xf32>
    %27 = vector.broadcast %26 : vector<1x128xf32> to vector<8x128xf32>
    %28 = arith.addf %25, %27 : vector<8x128xf32>
    %29 = math.tanh %28 : vector<8x128xf32>
    %c0_23 = arith.constant 0 : index
    %c0_24 = arith.constant 0 : index
    %30 = vector.load %arg10[%c0_23, %c0_24] : memref<1x32xf32, #tpu.memory_space<vmem>>, vector<1x32xf32>
    %31 = vector.broadcast %30 : vector<1x32xf32> to vector<8x32xf32>
    %32 = arith.mulf %16, %31 : vector<8x32xf32>
    %cst_25 = arith.constant dense<0.000000e+00> : vector<8xf32>
    %33 = vector.multi_reduction <add>, %32, %cst_25 [1] : vector<8x32xf32> to vector<8xf32>
    %34 = vector.shape_cast %33 : vector<8xf32> to vector<8x1xf32>
    %c0_26 = arith.constant 0 : index
    %c0_27 = arith.constant 0 : index
    %35 = vector.load %arg11[%c0_26, %c0_27] : memref<1x1xf32, #tpu.memory_space<vmem>>, vector<1x1xf32>
    %36 = vector.broadcast %35 : vector<1x1xf32> to vector<8x1xf32>
    %37 = arith.addf %34, %36 : vector<8x1xf32>
    %38 = tpu.iota {dimensions = array<i32: 1>} : vector<8x128xi32>
    %c8_i32 = arith.constant 8 : i32
    %39 = vector.broadcast %c8_i32 : i32 to vector<8x128xi32>
    %40 = arith.cmpi eq, %38, %39 : vector<8x128xi32>
    %41 = vector.shape_cast %37 : vector<8x1xf32> to vector<8x1xf32>
    %42 = vector.broadcast %41 : vector<8x1xf32> to vector<8x128xf32>
    %43 = arith.select %40, %42, %29 : vector<8x128xi1>, vector<8x128xf32>
    %c0_28 = arith.constant 0 : index
    %c0_29 = arith.constant 0 : index
    %44 = vector.load %arg12[%c0_28, %c0_29] : memref<8x128xf32, #tpu.memory_space<vmem>>, vector<8x128xf32>
    tpu.vector_store %arg12[%c0_28, %c0_29], %43 {strides = array<i32>} : memref<8x128xf32, #tpu.memory_space<vmem>>, vector<8x128xf32>,
    return
  }
  func.func @transform_0(%arg0: i32) -> (i32, i32) {
    %c0_i32 = arith.constant 0 : i32
    %c0_i32_0 = arith.constant 0 : i32
    return %arg0, %c0_i32 : i32, i32
  }
  func.func @transform_1(%arg0: i32) -> (i32, i32) {
    %c0_i32 = arith.constant 0 : i32
    %c0_i32_0 = arith.constant 0 : i32
    %c0_i32_1 = arith.constant 0 : i32
    return %c0_i32, %c0_i32_0 : i32, i32
  }
  func.func @transform_2(%arg0: i32) -> (i32, i32) {
    %c0_i32 = arith.constant 0 : i32
    %c0_i32_0 = arith.constant 0 : i32
    %c0_i32_1 = arith.constant 0 : i32
    return %c0_i32, %c0_i32_0 : i32, i32
  }
  func.func @transform_3(%arg0: i32) -> (i32, i32) {
    %c0_i32 = arith.constant 0 : i32
    %c0_i32_0 = arith.constant 0 : i32
    %c0_i32_1 = arith.constant 0 : i32
    return %c0_i32, %c0_i32_0 : i32, i32
  }
  func.func @transform_4(%arg0: i32) -> (i32, i32) {
    %c0_i32 = arith.constant 0 : i32
    %c0_i32_0 = arith.constant 0 : i32
    %c0_i32_1 = arith.constant 0 : i32
    return %c0_i32, %c0_i32_0 : i32, i32
  }
  func.func @transform_5(%arg0: i32) -> (i32, i32) {
    %c0_i32 = arith.constant 0 : i32
    %c0_i32_0 = arith.constant 0 : i32
    %c0_i32_1 = arith.constant 0 : i32
    return %c0_i32, %c0_i32_0 : i32, i32
  }
  func.func @transform_6(%arg0: i32) -> (i32, i32) {
    %c0_i32 = arith.constant 0 : i32
    %c0_i32_0 = arith.constant 0 : i32
    %c0_i32_1 = arith.constant 0 : i32
    return %c0_i32, %c0_i32_0 : i32, i32
  }
  func.func @transform_7(%arg0: i32) -> (i32, i32) {
    %c0_i32 = arith.constant 0 : i32
    %c0_i32_0 = arith.constant 0 : i32
    %c0_i32_1 = arith.constant 0 : i32
    return %c0_i32, %c0_i32_0 : i32, i32
  }
  func.func @transform_8(%arg0: i32) -> (i32, i32) {
    %c0_i32 = arith.constant 0 : i32
    %c0_i32_0 = arith.constant 0 : i32
    %c0_i32_1 = arith.constant 0 : i32
    return %c0_i32, %c0_i32_0 : i32, i32
  }
  func.func @transform_9(%arg0: i32) -> (i32, i32) {
    %c0_i32 = arith.constant 0 : i32
    %c0_i32_0 = arith.constant 0 : i32
    %c0_i32_1 = arith.constant 0 : i32
    return %c0_i32, %c0_i32_0 : i32, i32
  }
  func.func @transform_10(%arg0: i32) -> (i32, i32) {
    %c0_i32 = arith.constant 0 : i32
    %c0_i32_0 = arith.constant 0 : i32
    %c0_i32_1 = arith.constant 0 : i32
    return %c0_i32, %c0_i32_0 : i32, i32
  }
  func.func @transform_11(%arg0: i32) -> (i32, i32) {
    %c0_i32 = arith.constant 0 : i32
    %c0_i32_0 = arith.constant 0 : i32
    return %arg0, %c0_i32 : i32, i32
  }
}

</mosaic_0001>

<bundles_post_ra>
// kernel: tpu_custom_call.1
= control target key start
LH: loop header
LB: loop body
LE: loop exit
PB: predicated region body
PF: predicated region fallthrough
CT: control target
= control target key end

     0   :  { %s577_s0 = inlined_call_operand.hbm [shape: f32[8,32], index: 0, kind: input, shape index: {}]   ;;  %s578_s1 = inlined_call_operand.hbm [shape: f32[32,64], index: 1, kind: input, shape index: {}]   ;;  %s579_s2 = inlined_call_operand.vmem [shape: f32[1,64], index: 2, kind: input, shape index: {}]   ;;  %s580_s3 = inlined_call_operand.hbm [shape: f32[32,32], index: 3, kind: input, shape index: {}]   ;;  %s581_s4 = inlined_call_operand.vmem [shape: f32[1,32], index: 4, kind: input, shape index: {}]   ;;  %s582_s5 = inlined_call_operand.hbm [shape: f32[32,32], index: 5, kind: input, shape index: {}]   ;;  %s583_s6 = inlined_call_operand.vmem [shape: f32[1,32], index: 6, kind: input, shape index: {}]   ;;  %s584_s7 = inlined_call_operand.hbm [shape: f32[32,128], index: 7, kind: input, shape index: {}]   ;;  %s585_s8 = inlined_call_operand.vmem [shape: f32[1,128], index: 8, kind: input, shape index: {}]   ;;  %s586_s9 = inlined_call_operand.vmem [shape: f32[1,32], index: 9, kind: input, shape index: {}]   ;;  %s587_s10 = inlined_call_operand.<no memory space> [shape: f32[1,1], index: 10, kind: input, shape index: {}]   ;;  %s588_s11 = inlined_call_operand.hbm [shape: f32[8,128], index: 11, kind: output, shape index: {}]  }
   0x1   :  { %v16_v0 = vstv %s587_s10 }
   0x2   :  { %17 = vst [vmem:[#allocation2] sm:$0x1] %v16_v0 }
   0x3   :  { %18 = vsyncpa [#allocation4], 0 }
   0x4   :  { %19 = vsyncpa [#allocation7], 0 }
   0x5   :  { %20 = vsyncpa [#allocation10], 0  ;;  %s37_s21 = sshll.u32 %s578_s1, 4  ;;  %s38_s21 = int_to_ptr.hbm [resolvable:$true] %s37_s21 }
   0x6   :  { %21 = vsyncpa [#allocation5], 0  ;;  %s466_s22 = smov [#allocation6]   ;;  %s67_s26 = sshll.u32 %s582_s5, 4  ;;  %s68_s26 = int_to_ptr.hbm [resolvable:$true] %s67_s26 }
   0x7   :  { %s39_s23 = sshll.u32 %s466_s22, 4  ;;  %s467_s27 = smov 128   ;;  %s40_s23 = int_to_ptr.vmem [resolvable:$true] %s39_s23 }
   0x8   :  { %s468_s28 = smov 8   ;;  %s469_s10 = smov [#allocation9]  }
   0x9   :  { %45 = dma.hbm_to_vmem [thread:$0]  %s38_s21, 512, %s40_s23, [#allocation7], %s467_s27, %s467_s27, %s468_s28  }
   0xa   :  { %s69_s29 = sshll.u32 %s469_s10, 4  ;;  %s27_s13 = sshll.u32 %s577_s0, 4  ;;  %s70_s29 = int_to_ptr.vmem [resolvable:$true] %s69_s29  ;;  %s28_s13 = int_to_ptr.hbm [resolvable:$true] %s27_s13 }
   0xb   :  { %75 = dma.hbm_to_vmem [thread:$0]  %s68_s26, 512, %s70_s29, [#allocation10], %s467_s27, %s467_s27, %s468_s28  }
   0xc   :  { %s52_s15 = sshll.u32 %s580_s3, 4  ;;  %s470_s16 = smov [#allocation3]   ;;  %s53_s15 = int_to_ptr.hbm [resolvable:$true] %s52_s15 }
   0xd   :  { %s29_s17 = sshll.u32 %s470_s16, 4  ;;  %s471_s5 = smov [#allocation8]   ;;  %s30_s17 = int_to_ptr.vmem [resolvable:$true] %s29_s17 }
   0xe   :  { %32 = dma.hbm_to_vmem [thread:$0]  %s28_s13, 128, %s30_s17, [#allocation4]  }
   0xf   :  { %s54_s18 = sshll.u32 %s471_s5, 4  ;;  %s82_s21 = sshll.u32 %s584_s7, 4  ;;  %s55_s18 = int_to_ptr.vmem [resolvable:$true] %s54_s18  ;;  %s83_s21 = int_to_ptr.hbm [resolvable:$true] %s82_s21 }
  0x10   :  { %60 = dma.hbm_to_vmem [thread:$0]  %s53_s15, 512, %s55_s18, [#allocation7], %s467_s27, %s467_s27, %s468_s28  }
  0x11   :  { %s472_s0 = smov [#allocation11]  }
  0x12   :  { %s84_s22 = sshll.u32 %s472_s0, 4  ;;  %s85_s22 = int_to_ptr.vmem [resolvable:$true] %s84_s22 }
  0x13   :  { %90 = dma.hbm_to_vmem [thread:$0]  %s83_s21, 512, %s85_s22, [#allocation10], %s467_s27, %s467_s27, %s468_s28  }
  0x14   :  { %458 = dma.done.wait [#allocation4], 128  }
  0x15   :  { %459 = vsyncadd [#allocation4], 4294967168 }
  0x16   :  { %460 = dma.done.wait [#allocation7], 1024  }
  0x17   :  { %461 = vsyncadd [#allocation7], 4294966272 }
  0x18   :  { %462 = dma.done.wait [#allocation10], 1024  }
  0x19   :  { %463 = vsyncadd [#allocation10], 4294966272  ;;  %v121_v1 = vld [vmem:[#allocation6 + $0x18] sm:$0xff]  ;;  %v120_v2 = vld [vmem:[#allocation6 + $0x10] sm:$0xff]  ;;  %vm126_vm0 = vcmask 261120   ;;  %s473_s23 = smov 96   ;;  %v261_v39 = vlaneseq }
  0x1a   :  { %142 = vmatpush.msra.mxu0 %v121_v1  ;;  %v154_v3 = vld [vmem:[#allocation8 + $0x18] sm:$0xff]  ;;  %v119_v4 = vld [vmem:[#allocation6 + $0x8] sm:$0xff]  ;;  %v118_v5 = vld [vmem:[#allocation6] sm:$0xff]  ;;  %v474_v30 = vmov 0   ;;  %s475_s10 = smov [#allocation12]   ;;  %s278_s12 = sshll.u32 %s588_s11, 4  ;;  %s279_s12 = int_to_ptr.hbm [resolvable:$true] %s278_s12 }
  0x1b   :  { %174 = vmatpush.msra.mxu1 %v154_v3  ;;  %v117_v6 = vld [vmem:[#allocation3] sm:$0xff]  ;;  %v153_v7 = vld [vmem:[#allocation8 + $0x10] sm:$0xff]  ;;  %v152_v8 = vld [vmem:[#allocation8 + $0x8] sm:$0xff]  ;;  %304 = vset.pattern.permute.xlu1 %v474_v30  ;;  %v262_v42 = vand.u32 127, %v261_v39 }
  0x1c   :  { %143 = vmatpush.msra.mxu0 %v120_v2  ;;  %v151_v9 = vld [vmem:[#allocation8] sm:$0xff]  ;;  %v186_v10 = vld [vmem:[#allocation9 + $0x18] sm:$0xff]  ;;  %v185_v11 = vld [vmem:[#allocation9 + $0x10] sm:$0xff]  ;;  %305 = vset.pattern.permute.xlu0 %v474_v30 }
  0x1d   :  { %175 = vmatpush.msra.mxu1 %v153_v7  ;;  %207 = vmatpush.msra.mxu2 %v186_v10  ;;  %v184_v12 = vld [vmem:[#allocation9 + $0x8] sm:$0xff]  ;;  %v183_v13 = vld [vmem:[#allocation9] sm:$0xff]  ;;  %v306_v14 = vld [vmem:[%s579_s2] ss:$0 sm:$0xff]  ;;  %vm263_vm1 = vcmp.eq.s32.totalorder %v262_v42, 8 }
  0x1e   :  { %144 = vmatpush.msra.mxu0 %v119_v4  ;;  %v219_v18 = vld [vmem:[#allocation11 + $0x18] sm:$0xff]  ;;  %v307_v20 = vld [vmem:[%s581_s4] ss:$0 sm:$0xff]  ;;  %v217_v28 = vld [vmem:[#allocation11 + $0x8] sm:$0xff] }
  0x1f   :  { %176 = vmatpush.msra.mxu1 %v152_v8  ;;  %208 = vmatpush.msra.mxu2 %v185_v11  ;;  %v308_v23 = vld [vmem:[%s586_s9] ss:$0 sm:$0xff]  ;;  %v216_v29 = vld [vmem:[#allocation11] sm:$0xff] }
  0x20   :  { %145 = vmatpush.msra.mxu0 %v118_v5  ;;  %239 = vmatpush.msra.mxu3 %v219_v18  ;;  %v218_v27 = vld [vmem:[#allocation11 + $0x10] sm:$0xff] }
  0x21   :  { %290 = vmatmul.msk.f32.vlgmr.msra.gmra.mxu0 %vm126_vm0, %v117_v6  ;;  %177 = vmatpush.msra.mxu1 %v151_v9  ;;  %v309_v31 = vld [vmem:[%s583_s6] ss:$0 sm:$0xff]  ;;  %s276_s6 = sshll.u32 %s475_s10, 4  ;;  %s277_s6 = int_to_ptr.vmem [resolvable:$true] %s276_s6 }
  0x22   :  { %209 = vmatpush.msra.mxu2 %v184_v12  ;;  %240 = vmatpush.msra.mxu3 %v218_v27  ;;  %v310_v32 = vld [vmem:[#allocation2] ss:$0 sm:$0xff] }
  0x23   :  { %v311_v38 = vld [vmem:[%s585_s8] ss:$0 sm:$0xff] }
  0x24   :  { %210 = vmatpush.msra.mxu2 %v183_v13  ;;  %241 = vmatpush.msra.mxu3 %v217_v28 }
  0x26   :  { %242 = vmatpush.msra.mxu3 %v216_v29 }
  0x9e   :  { %v147_v15 = vpop.f32.mrf.mxu0 }
  0x9f   :  { %v148_v16 = vadd.f32 %v306_v14, %v147_v15 }
  0xa1   :  { %v150_v17 = vmax.f32 %v148_v16, 0.0 }
  0xa3   :  { %191 = vrot.lane.b32.xlu0 %v150_v17, %s473_s23  ;;  %291 = vmatmul.msk.f32.vlgmr.msra.gmra.mxu1 %vm126_vm0, %v150_v17 }
 0x115   :  { %v192_v19 = vpop.permute.xlu0 %191 }
 0x116   :  { %292 = vmatmul.msk.f32.vlgmr.msra.gmra.mxu2 %vm126_vm0, %v192_v19 }
 0x120   :  { %v179_v21 = vpop.f32.mrf.mxu1 }
 0x121   :  { %v180_v22 = vadd.f32 %v307_v20, %v179_v21 }
 0x123   :  { %v182_v24 = vmax.f32 %v180_v22, 0.0 }
 0x125   :  { %v252_v25 = vmul.f32 %v308_v23, %v182_v24 }
 0x127   :  { %v253_v26 = vsel %vm126_vm0, %v252_v25, 0.0 }
 0x128   :  { %254 = vadd.xlane.f32.xlu0 %v253_v26 }
 0x199   :  { %v212_v33 = vpop.f32.mrf.mxu2 }
 0x19a   :  { %v213_v34 = vadd.f32 %v309_v31, %v212_v33 }
 0x19b   :  { %v255_v35 = vpop.xlane.xlu0 %254 }
 0x19c   :  { %v215_v36 = vmax.f32 %v213_v34, 0.0  ;;  %v260_v37 = vadd.f32 %v310_v32, %v255_v35 }
 0x19e   :  { %293 = vmatmul.msk.f32.vlgmr.msra.gmra.mxu3 %vm126_vm0, %v215_v36  ;;  %266 = vperm.xlu1 %304, %v260_v37  }
 0x210   :  { %v267_v44 = vpop.permute.xlu1 %266 }
 0x221   :  { %v244_v40 = vpop.f32.mrf.mxu3 }
 0x222   :  { %v245_v41 = vadd.f32 %v311_v38, %v244_v40 }
 0x224   :  { %312 = vtanh.f32 %v245_v41 }
 0x22a   :  { %v313_v43 = vpop.eup %312 }
 0x22b   :  { %v269_v45 = vsel %vm263_vm1, %v267_v44, %v313_v43 }
 0x22c   :  { %270 = vst [vmem:[#allocation12] sm:$0xff] %v269_v45 }
 0x22d   :  { %281 = dma.vmem_to_hbm [thread:$0]  %s277_s6, 128, %s279_s12, [#allocation5]  }
 0x22e   :  { %464 = dma.done.wait [#allocation5], 128  }
 0x22f   :  { %465 = vsyncadd [#allocation5], 4294967168 }
 0x230   :  { %286 = vsyncpa [#allocation4], 1 }
 0x231   :  { %287 = vsyncpa [#allocation7], 1 }
 0x232   :  { %288 = vsyncpa [#allocation10], 1 }
 0x233   :  { %289 = vsyncpa [#allocation5], 1 }

</bundles_post_ra>
